<compile_context>
chip_gen: v5e
topology: v5e:2x2
jax: 0.10.0
libtpu: 0.0.40
codegen_flags: <defaults>
</compile_context>

<pallas_src>
import math
import functools

import jax
import jax.numpy as jnp
from jax.experimental import pallas as pl
from jax.experimental.pallas import tpu as pltpu


def _round_up(a: int, b: int) -> int:
    return ((a + b - 1) // b) * b


def _sin_emb_kernel(x_ref, fm_ref, off_ref, o_ref, *, groups: int):
    # x_ref:   (TM, g)       g consecutive input scalars folded per lane-dense output row
    # fm_ref:  (g, lane_w)   scale*freq table, zero outside each row-group's lane range
    # off_ref: (1, lane_w)   phase offset: 0.0 on sin lanes, pi/2 on cos lanes
    # o_ref:   (TM, lane_w)  lane-dense output tile
    xg = x_ref[...].astype(jnp.float32)                       # (TM, g)
    fm = fm_ref[...]                                           # (g, lane_w)
    phase = off_ref[...] + xg[:, 0:1] * fm[0:1, :]             # (TM, lane_w)
    for r in range(1, groups):                                 # g-term FMA chain (VPU)
        phase = phase + xg[:, r:r + 1] * fm[r:r + 1, :]
    o_ref[...] = jnp.sin(phase).astype(o_ref.dtype)            # ONE transcendental per lane


def sinusoidal_embedding(x: jax.Array, size: int, scale: float = 1.0,
                         out_dtype=jnp.float32) -> jax.Array:
    half = size // 2
    assert half >= 2, "size must be >= 4"
    out_dim = 2 * half                      # matches torch.cat((sin, cos), -1)

    orig_shape = x.shape
    n = int(math.prod(orig_shape)) if orig_shape else 1

    # Lane-dense grouping: fold g rows so the output lane width is a multiple of 128.
    g = 128 // math.gcd(out_dim, 128)
    if g > 16:                               # degenerate tiny sizes: fall back to masked stores
        g = 1
    lane_w = g * out_dim

    # --- constant tables (tiny, computed once, constant across the grid) ----------------
    j = jnp.arange(half, dtype=jnp.float32)
    freqs = jnp.exp(-(math.log(10000.0) / (half - 1)) * j) * jnp.float32(scale)  # (half,)
    f_block = jnp.concatenate([freqs, freqs])                                     # (out_dim,)
    off_block = jnp.concatenate([jnp.zeros((half,), jnp.float32),                 # sin lanes
                                 jnp.full((half,), jnp.float32(math.pi / 2))])    # cos lanes
    lane = jnp.arange(lane_w)
    group_id = lane // out_dim                                                     # (lane_w,)
    fm = (group_id[None, :] == jnp.arange(g)[:, None]).astype(jnp.float32) \
        * jnp.tile(f_block, g)[None, :]                                           # (g, lane_w)
    off = jnp.tile(off_block, g)[None, :]                                          # (1, lane_w)

    # --- flatten + pad only to a multiple of g (tiny; no tile-multiple padding) ---------
    x_flat = x.reshape(n)
    n_g = _round_up(n, g)
    if n_g != n:
        x_flat = jnp.pad(x_flat, (0, n_g - n))
    ng = n_g // g
    xg = x_flat.reshape(ng, g)

    # --- tile sizing ---------------------------------------------------------------------
    out_itemsize = jnp.dtype(out_dtype).itemsize
    sub = 8 if out_itemsize >= 4 else 32 // out_itemsize          # sublane granule (16 for bf16)
    # Double-buffered VMEM per grouped row: x block lane-pads to 128 lanes (128*4 B) + out row.
    row_bytes = 2 * (128 * 4 + lane_w * out_itemsize)
    budget = 24 * 1024 * 1024
    tile_budget = max(sub, (budget // row_bytes // sub) * sub)
    # Keep >= ~4 grid steps for large inputs (v7x dual-TC sharding of the "parallel" axis),
    # but never shrink tiles below ~1024 rows (amortize ~0.35us/step on v5e/v6e).
    tile_split = max(1024, _round_up(-(-ng // 4), sub))
    tile_m = min(tile_budget, tile_split, _round_up(ng, sub))
    tile_m = max(tile_m, sub)

    grid = (pl.cdiv(ng, tile_m),)        # ragged last block handled by Pallas (masked writeback)

    out = pl.pallas_call(
        functools.partial(_sin_emb_kernel, groups=g),
        out_shape=jax.ShapeDtypeStruct((ng, lane_w), out_dtype),
        grid=grid,
        in_specs=[
            pl.BlockSpec((tile_m, g), lambda i: (i, 0)),       # x rows for this tile
            pl.BlockSpec((g, lane_w), lambda i: (0, 0)),       # freq*scale table (constant)
            pl.BlockSpec((1, lane_w), lambda i: (0, 0)),       # phase-offset row (constant)
        ],
        out_specs=pl.BlockSpec((tile_m, lane_w), lambda i: (i, 0)),
        compiler_params=pltpu.CompilerParams(
            dimension_semantics=("parallel",),
            vmem_limit_bytes=48 * 1024 * 1024,
        ),
    )(xg, fm, off)

    # Free row-major reshape back to (N, out_dim); slice only if n was not a multiple of g.
    out = out.reshape(n_g, out_dim)
    if n_g != n:
        out = out[:n]
    return out.reshape(*orig_shape, out_dim)


if __name__ == "__main__":
    size = 32
    scale = 1.0
    batch, seq = 2, 8

    key = jax.random.PRNGKey(0)
    # Input: float positions / timesteps, typical usage of the module.
    x = jax.random.uniform(key, (batch, seq), jnp.float32, minval=0.0, maxval=10.0)

    out = sinusoidal_embedding(x, size, scale)
    out = jax.block_until_ready(out)

    # Reference in plain JAX, mirroring the PyTorch forward exactly.
    half = size // 2
    f = jnp.exp(-(math.log(10000.0) / (half - 1)) * jnp.arange(half, dtype=jnp.float32))
    e = (x * scale)[..., None] * f
    ref = jnp.concatenate([jnp.sin(e), jnp.cos(e)], axis=-1)

    assert out.shape == (batch, seq, size), out.shape
    assert jnp.allclose(out, ref, atol=1e-4, rtol=1e-4), float(jnp.max(jnp.abs(out - ref)))

    print("KERNEL_OK")
</pallas_src>

<mosaic_0001>
module attributes {stable_mosaic.version = 11 : i64} {
  func.func @_sin_emb_kernel(%arg0: i32, %arg1: memref<8x4xf32, #tpu.memory_space<vmem>>, %arg2: memref<4x128xf32, #tpu.memory_space<vmem>>, %arg3: memref<1x128xf32, #tpu.memory_space<vmem>>, %arg4: memref<8x128xf32, #tpu.memory_space<vmem>>) attributes {dimension_semantics = [#tpu.dimension_semantics<parallel>], iteration_bounds = array<i64: 1>, scalar_prefetch = 0 : i64, scratch_operands = 0 : i64, tpu.core_type = #tpu.core_type<tc>, window_params = [{transform_indices = @transform_0, window_bounds = array<i64: 8, 4>}, {pipeline_mode = #tpu.pipeline_mode<synchronous>, transform_indices = @transform_1, window_bounds = array<i64: 4, 128>}, {pipeline_mode = #tpu.pipeline_mode<synchronous>, transform_indices = @transform_2, window_bounds = array<i64: 1, 128>}, {transform_indices = @transform_3, window_bounds = array<i64: 8, 128>}]} {
    %c0 = arith.constant 0 : index
    %c0_0 = arith.constant 0 : index
    %0 = vector.load %arg1[%c0, %c0_0] : memref<8x4xf32, #tpu.memory_space<vmem>>, vector<8x4xf32>
    %c0_1 = arith.constant 0 : index
    %c0_2 = arith.constant 0 : index
    %1 = vector.load %arg2[%c0_1, %c0_2] : memref<4x128xf32, #tpu.memory_space<vmem>>, vector<4x128xf32>
    %c0_3 = arith.constant 0 : index
    %c0_4 = arith.constant 0 : index
    %2 = vector.load %arg3[%c0_3, %c0_4] : memref<1x128xf32, #tpu.memory_space<vmem>>, vector<1x128xf32>
    %3 = vector.extract_strided_slice %0 {offsets = [0, 0], sizes = [8, 1], strides = [1, 1]} : vector<8x4xf32> to vector<8x1xf32>
    %4 = vector.extract_strided_slice %1 {offsets = [0, 0], sizes = [1, 128], strides = [1, 1]} : vector<4x128xf32> to vector<1x128xf32>
    %5 = vector.broadcast %3 : vector<8x1xf32> to vector<8x128xf32>
    %6 = vector.broadcast %4 : vector<1x128xf32> to vector<8x128xf32>
    %7 = arith.mulf %5, %6 : vector<8x128xf32>
    %8 = vector.broadcast %2 : vector<1x128xf32> to vector<8x128xf32>
    %9 = arith.addf %8, %7 : vector<8x128xf32>
    %10 = vector.extract_strided_slice %0 {offsets = [0, 1], sizes = [8, 1], strides = [1, 1]} : vector<8x4xf32> to vector<8x1xf32>
    %11 = vector.extract_strided_slice %1 {offsets = [1, 0], sizes = [1, 128], strides = [1, 1]} : vector<4x128xf32> to vector<1x128xf32>
    %12 = vector.broadcast %10 : vector<8x1xf32> to vector<8x128xf32>
    %13 = vector.broadcast %11 : vector<1x128xf32> to vector<8x128xf32>
    %14 = arith.mulf %12, %13 : vector<8x128xf32>
    %15 = arith.addf %9, %14 : vector<8x128xf32>
    %16 = vector.extract_strided_slice %0 {offsets = [0, 2], sizes = [8, 1], strides = [1, 1]} : vector<8x4xf32> to vector<8x1xf32>
    %17 = vector.extract_strided_slice %1 {offsets = [2, 0], sizes = [1, 128], strides = [1, 1]} : vector<4x128xf32> to vector<1x128xf32>
    %18 = vector.broadcast %16 : vector<8x1xf32> to vector<8x128xf32>
    %19 = vector.broadcast %17 : vector<1x128xf32> to vector<8x128xf32>
    %20 = arith.mulf %18, %19 : vector<8x128xf32>
    %21 = arith.addf %15, %20 : vector<8x128xf32>
    %22 = vector.extract_strided_slice %0 {offsets = [0, 3], sizes = [8, 1], strides = [1, 1]} : vector<8x4xf32> to vector<8x1xf32>
    %23 = vector.extract_strided_slice %1 {offsets = [3, 0], sizes = [1, 128], strides = [1, 1]} : vector<4x128xf32> to vector<1x128xf32>
    %24 = vector.broadcast %22 : vector<8x1xf32> to vector<8x128xf32>
    %25 = vector.broadcast %23 : vector<1x128xf32> to vector<8x128xf32>
    %26 = arith.mulf %24, %25 : vector<8x128xf32>
    %27 = arith.addf %21, %26 : vector<8x128xf32>
    %28 = math.sin %27 : vector<8x128xf32>
    %c0_5 = arith.constant 0 : index
    %c0_6 = arith.constant 0 : index
    %29 = vector.load %arg4[%c0_5, %c0_6] : memref<8x128xf32, #tpu.memory_space<vmem>>, vector<8x128xf32>
    tpu.vector_store %arg4[%c0_5, %c0_6], %28 {strides = array<i32>} : memref<8x128xf32, #tpu.memory_space<vmem>>, vector<8x128xf32>,
    return
  }
  func.func @transform_0(%arg0: i32) -> (i32, i32) {
    %c0_i32 = arith.constant 0 : i32
    %c0_i32_0 = arith.constant 0 : i32
    return %arg0, %c0_i32 : i32, i32
  }
  func.func @transform_1(%arg0: i32) -> (i32, i32) {
    %c0_i32 = arith.constant 0 : i32
    %c0_i32_0 = arith.constant 0 : i32
    %c0_i32_1 = arith.constant 0 : i32
    return %c0_i32, %c0_i32_0 : i32, i32
  }
  func.func @transform_2(%arg0: i32) -> (i32, i32) {
    %c0_i32 = arith.constant 0 : i32
    %c0_i32_0 = arith.constant 0 : i32
    %c0_i32_1 = arith.constant 0 : i32
    return %c0_i32, %c0_i32_0 : i32, i32
  }
  func.func @transform_3(%arg0: i32) -> (i32, i32) {
    %c0_i32 = arith.constant 0 : i32
    %c0_i32_0 = arith.constant 0 : i32
    return %arg0, %c0_i32 : i32, i32
  }
}

</mosaic_0001>

<bundles_post_ra>
// kernel: tpu_custom_call.1
= control target key start
LH: loop header
LB: loop body
LE: loop exit
PB: predicated region body
PF: predicated region fallthrough
CT: control target
= control target key end

     0   :  { %8 = vsyncpa [#allocation3], 0  ;;  %s472_s0 = inlined_call_operand.hbm [shape: f32[4,4], index: 0, kind: input, shape index: {}]   ;;  %s473_s1 = inlined_call_operand.hbm [shape: f32[4,128], index: 1, kind: input, shape index: {}]   ;;  %s474_s2 = inlined_call_operand.vmem [shape: f32[1,128], index: 2, kind: input, shape index: {}]   ;;  %s475_s3 = inlined_call_operand.hbm [shape: f32[4,128], index: 3, kind: output, shape index: {}]  }
   0x1   :  { %9 = vsyncpa [#allocation6], 0 }
   0x2   :  { %10 = vsyncpa [#allocation4], 0 }
   0x3   :  { %14 = vsyncadd [#allocation3], 64  ;;  %s15_s14 = sshll.u32 %s472_s0, 4  ;;  %s358_s15 = smov [#allocation2]   ;;  %s16_s14 = int_to_ptr.hbm [resolvable:$true] %s15_s14 }
   0x4   :  { %s17_s16 = sshll.u32 %s358_s15, 4  ;;  %s29_s19 = sshll.u32 %s473_s1, 4  ;;  %s18_s16 = int_to_ptr.vmem [resolvable:$true] %s17_s16  ;;  %s30_s19 = int_to_ptr.hbm [resolvable:$true] %s29_s19 }
   0x5   :  { %s359_s20 = smov 64   ;;  %s360_s21 = smov 4  }
   0x6   :  { %23 = dma.hbm_to_vmem [thread:$0]  %s16_s14, 64, %s18_s16, [#allocation3], %s359_s20, %s359_s20, %s360_s21  }
   0x7   :  { %s361_s22 = smov [#allocation5]  }
   0x8   :  { %s31_s23 = sshll.u32 %s361_s22, 4  ;;  %s32_s23 = int_to_ptr.vmem [resolvable:$true] %s31_s23 }
   0x9   :  { %34 = dma.hbm_to_vmem [thread:$0]  %s30_s19, 64, %s32_s23, [#allocation6]  }
   0xa   :  { %352 = dma.done.wait [#allocation3], 128  }
   0xb   :  { %353 = vsyncadd [#allocation3], 4294967168 }
   0xc   :  { %354 = dma.done.wait [#allocation6], 64  }
   0xd   :  { %355 = vsyncadd [#allocation6], 4294967232  ;;  %v362_v0 = vmov 0   ;;  %v363_v1 = vmov 2   ;;  %v45_v2 = vld [vmem:[#allocation2] sm:$0xff]  ;;  %v364_v3 = vmov 1  }
   0xe   :  { %274 = vset.pattern.permute.xlu0 %v362_v0  ;;  %276 = vset.pattern.permute.xlu1 %v363_v1  ;;  %v365_v4 = vmov 3   ;;  %v46_v5 = vld [vmem:[#allocation5] sm:$0xf]  ;;  %v279_v9 = vld [vmem:[%s474_s2] ss:$0 sm:$0xff] }
   0xf   :  { %50 = vperm.xlu0 %274, %v45_v2   ;;  %67 = vperm.xlu1 %276, %v45_v2   ;;  %v53_v8 = vperm.slane %v46_v5, 0  ;;  %v63_v11 = vperm.slane %v46_v5, 1  ;;  %v70_v12 = vperm.slane %v46_v5, 2  ;;  %v77_v13 = vperm.slane %v46_v5, 3 }
  0x10   :  { %v366_v34 = vmov 683565275   ;;  %v367_v36 = vmov 2475754826   ;;  %v368_v39 = vmov 2131351028  }
  0x11   :  { %v369_v42 = vmov 2102212464   ;;  %v370_v45 = vmov 920167782   ;;  %v371_v48 = vmov 1326507024  }
  0x17   :  { %275 = vset.pattern.permute.xlu0 %v364_v3  ;;  %277 = vset.pattern.permute.xlu1 %v365_v4 }
  0x18   :  { %60 = vperm.xlu0 %275, %v45_v2   ;;  %74 = vperm.xlu1 %277, %v45_v2  }
  0x20   :  { %278 = vset.pattern.permute.xlu0 %v365_v4 }
  0x81   :  { %v51_v6 = vpop.permute.xlu0 %50  ;;  %v68_v7 = vpop.permute.xlu1 %67 }
  0x82   :  { %v54_v10 = vmul.f32 %v53_v8, %v51_v6  ;;  %v71_v18 = vmul.f32 %v70_v12, %v68_v7 }
  0x84   :  { %v58_v16 = vadd.f32 %v279_v9, %v54_v10 }
  0x8a   :  { %v61_v14 = vpop.permute.xlu0 %60  ;;  %v75_v15 = vpop.permute.xlu1 %74 }
  0x8b   :  { %v64_v17 = vmul.f32 %v63_v11, %v61_v14  ;;  %v78_v20 = vmul.f32 %v77_v13, %v75_v15 }
  0x8d   :  { %v65_v19 = vadd.f32 %v64_v17, %v58_v16 }
  0x8f   :  { %v72_v21 = vadd.f32 %v71_v18, %v65_v19 }
  0x91   :  { %v406_v22 = vadd.f32 %v78_v20, %v72_v21 }
  0x93   :  { %v83_v23 = vand.u32 2139095040, %v406_v22  ;;  %v80_v26 = vand.u32 2147483647, %v406_v22  ;;  %vm82_vm12 = vcmp.lt.s32.totalorder %v406_v22, 0 }
  0x95   :  { %v84_v24 = vshrl.u32 %v83_v23, 23  ;;  %v87_v28 = vand.u32 8388607, %v80_v26  ;;  %vm81_vm13 = vcmp.le.f32.partialorder %v80_v26, 0.7853982 }
  0x97   :  { %v256_v25 = vadd.s32 4294967169, %v84_v24  ;;  %v88_v32 = vor.u32 8388608, %v87_v28 }
  0x99   :  { %v90_v27 = vadd.s32 1, %v256_v25  ;;  %v423_v55 = vshll.u32 %v88_v32, 8 }
  0x9b   :  { %vm91_vm0 = vcmp.gt.s32.totalorder %v90_v27, 0  ;;  %v129_v1 = vand.u32 65535, %v423_v55  ;;  %v130_v2 = vshrl.u32 %v423_v55, 16 }
  0x9c   :  { %v92_v29 = vsel %vm91_vm0, %v90_v27, 0 }
  0x9d   :  { %v94_v30 = vand.u32 31, %v92_v29  ;;  %v414_v33 = vshrl.u32 %v92_v29, 5 }
  0x9f   :  { %v412_v31 = vsub.s32 32, %v94_v30  ;;  %v97_v35 = vshll.u32 %v366_v34, %v94_v30  ;;  %v100_v37 = vshll.u32 %v367_v36, %v94_v30  ;;  %v103_v41 = vshll.u32 %v368_v39, %v94_v30 }
  0xa0   :  { %v106_v44 = vshll.u32 %v369_v42, %v94_v30  ;;  %v109_v47 = vshll.u32 %v370_v45, %v94_v30  ;;  %vm112_vm1 = vcmp.lt.s32.totalorder %v414_v33, 1  ;;  %vm115_vm2 = vcmp.lt.s32.totalorder %v414_v33, 4 }
  0xa1   :  { %v98_v38 = vshrl.u32 %v367_v36, %v412_v31  ;;  %v101_v40 = vshrl.u32 %v368_v39, %v412_v31  ;;  %v104_v43 = vshrl.u32 %v369_v42, %v412_v31  ;;  %v107_v46 = vshrl.u32 %v370_v45, %v412_v31 }
  0xa2   :  { %v110_v49 = vshrl.u32 %v371_v48, %v412_v31  ;;  %vm114_vm3 = vcmp.lt.s32.totalorder %v414_v33, 3  ;;  %vm113_vm4 = vcmp.lt.s32.totalorder %v414_v33, 2  ;;  %v96_v29 = vshrl.u32 %v366_v34, %v412_v31 }
  0xa3   :  { %v99_v50 = vor.u32 %v98_v38, %v97_v35  ;;  %v102_v51 = vor.u32 %v101_v40, %v100_v37  ;;  %v105_v52 = vor.u32 %v104_v43, %v103_v41  ;;  %v108_v53 = vor.u32 %v107_v46, %v106_v44 }
  0xa4   :  { %v111_v54 = vor.u32 %v110_v49, %v109_v47 }
  0xa5   :  { %v120_v56 = vsel %vm112_vm1, %v99_v50, %v102_v51  ;;  %v124_v57 = vsel %vm112_vm1, %v102_v51, %v105_v52  ;;  %v121_v58 = vsel %vm115_vm2, %v108_v53, 920167782  ;;  %v117_v25 = vsel %vm115_vm2, %v105_v52, 2102212464 }
  0xa6   :  { %v125_v59 = vsel %vm115_vm2, %v111_v54, 1326507024  ;;  %v122_v60 = vsel %vm114_vm3, %v105_v52, %v121_v58  ;;  %v116_v38 = vsel %vm112_vm1, %v96_v29, %v99_v50  ;;  %v118_v39 = vsel %vm114_vm3, %v102_v51, %v117_v25 }
  0xa7   :  { %v126_v61 = vsel %vm114_vm3, %v108_v53, %v125_v59  ;;  %v123_v62 = vsel %vm113_vm4, %v120_v56, %v122_v60  ;;  %v119_v31 = vsel %vm113_vm4, %v116_v38, %v118_v39  ;;  %vm223_vm1 = vweird.f32 %v406_v22 }
  0xa8   :  { %v127_v63 = vsel %vm113_vm4, %v124_v57, %v126_v61  ;;  %v153_v5 = vand.u32 65535, %v123_v62  ;;  %v154_v6 = vshrl.u32 %v123_v62, 16  ;;  %v173_v46 = vmul.u32 %v423_v55, %v119_v31 }
  0xa9   :  { %v131_v3 = vand.u32 65535, %v127_v63  ;;  %v132_v4 = vshrl.u32 %v127_v63, 16 }
  0xaa   :  { %v156_v9 = vmul.u32 %v154_v6, %v129_v1  ;;  %v157_v10 = vmul.u32 %v153_v5, %v130_v2  ;;  %v155_v14 = vmul.u32 %v153_v5, %v129_v1  ;;  %v158_v18 = vmul.u32 %v154_v6, %v130_v2 }
  0xab   :  { %v134_v7 = vmul.u32 %v132_v4, %v129_v1  ;;  %v135_v8 = vmul.u32 %v131_v3, %v130_v2  ;;  %v133_v11 = vmul.u32 %v131_v3, %v129_v1  ;;  %v136_v13 = vmul.u32 %v132_v4, %v130_v2 }
  0xac   :  { %v159_v15 = vshll.u32 %v156_v9, 16  ;;  %v161_v20 = vshll.u32 %v157_v10, 16  ;;  %v160_v36 = vshrl.u32 %v156_v9, 16  ;;  %v162_v42 = vshrl.u32 %v157_v10, 16 }
  0xad   :  { %v137_v12 = vshll.u32 %v134_v7, 16  ;;  %v139_v16 = vshll.u32 %v135_v8, 16  ;;  %v138_v30 = vshrl.u32 %v134_v7, 16  ;;  %v140_v40 = vshrl.u32 %v135_v8, 16 }
  0xae   :  { %vm163_vm6 = vc.u32 %v155_v14, %v159_v15  ;;  %v165_v21 = vadd.s32 %v159_v15, %v155_v14 }
  0xaf   :  { %vm141_vm5 = vc.u32 %v133_v11, %v137_v12  ;;  %v143_v17 = vadd.s32 %v137_v12, %v133_v11  ;;  %v164_v24 = vsel %vm163_vm6, 1, %v362_v0 }
  0xb0   :  { %v142_v19 = vsel %vm141_vm5, 1, %v362_v0  ;;  %v166_v28 = vadd.s32 %v164_v24, %v158_v18  ;;  %vm167_vm8 = vc.u32 %v165_v21, %v161_v20  ;;  %v169_v45 = vadd.s32 %v165_v21, %v161_v20 }
  0xb1   :  { %v144_v23 = vadd.s32 %v142_v19, %v136_v13  ;;  %vm145_vm7 = vc.u32 %v143_v17, %v139_v16  ;;  %v168_v35 = vsel %vm167_vm8, 1, %v362_v0 }
  0xb2   :  { %v146_v27 = vsel %vm145_vm7, 1, %v362_v0  ;;  %v170_v37 = vadd.s32 %v168_v35, %v166_v28 }
  0xb3   :  { %v148_v32 = vadd.s32 %v146_v27, %v144_v23 }
  0xb4   :  { %v171_v43 = vadd.s32 %v170_v37, %v160_v36 }
  0xb5   :  { %v149_v41 = vadd.s32 %v148_v32, %v138_v30 }
  0xb6   :  { %v172_v34 = vadd.s32 %v171_v43, %v162_v42 }
  0xb7   :  { %v150_v44 = vadd.s32 %v149_v41, %v140_v40 }
  0xb8   :  { %v176_v0 = vadd.s32 1, %v172_v34 }
  0xb9   :  { %vm175_vm9 = vc.u32 %v150_v44, %v169_v45  ;;  %v174_v33 = vadd.s32 %v169_v45, %v150_v44 }
  0xba   :  { %v177_v47 = vsel %vm175_vm9, %v176_v0, %v172_v34 }
  0xbb   :  { %v178_v48 = vadd.s32 %v177_v47, %v173_v46 }
  0xbd   :  { %v179_v49 = vadd.s32 536870912, %v178_v48 }
  0xbf   :  { %v180_v50 = vshrl.u32 %v179_v49, 30 }
  0xc1   :  { %v181_v52 = vshll.u32 %v180_v50, 30  ;;  %v204_v8 = vsub.s32 4, %v180_v50 }
  0xc3   :  { %v182_v51 = vsub.s32 %v178_v48, %v181_v52  ;;  %v205_v13 = vsel %vm82_vm12, %v204_v8, %v180_v50 }
  0xc4   :  { %v207_v16 = vsel %vm81_vm13, 0, %v205_v13 }
  0xc5   :  { %vm183_vm10 = vcmp.lt.s32.totalorder %v182_v51, 0  ;;  %v184_v53 = vsub.s32 0, %v182_v51  ;;  %v224_v21 = vadd.s32 3, %v207_v16 }
  0xc7   :  { %v185_v54 = vsel %vm183_vm10, %v184_v53, %v182_v51  ;;  %v225_v27 = vand.u32 3, %v224_v21 }
  0xc8   :  { %v186_v56 = vclz %v185_v54 }
  0xc9   :  { %vm227_vm14 = vcmp.eq.s32.totalorder %v225_v27, 0  ;;  %vm230_vm15 = vcmp.eq.s32.totalorder %v225_v27, 2  ;;  %vm226_vm0 = vcmp.lt.s32.totalorder %v225_v27, 2 }
  0xca   :  { %v257_v57 = vadd.s32 4294967294, %v186_v56 }
  0xcc   :  { %vm258_vm11 = vcmp.lt.s32.totalorder %v257_v57, 0 }
  0xcd   :  { %v189_v58 = vsel %vm258_vm11, 0, %v257_v57 }
  0xce   :  { %v190_v59 = vsub.s32 32, %v189_v58  ;;  %v194_v60 = vsub.s32 4294967266, %v189_v58  ;;  %v191_v61 = vshll.u32 %v182_v51, %v189_v58 }
  0xd0   :  { %v192_v62 = vshrl.u32 %v174_v33, %v190_v59  ;;  %v195_v63 = vadd.s32 127, %v194_v60 }
  0xd2   :  { %v193_v55 = vor.u32 %v192_v62, %v191_v61  ;;  %v196_v1 = vshll.u32 %v195_v63, 23 }
  0xd4   :  { %v197_v2 = vor.u32 4788187, %v196_v1  ;;  %v200_v4 = vcvt.s32.f32 %v193_v55 }
  0xd6   :  { %v198_v3 = vand.u32 2147483647, %v197_v2 }
  0xd8   :  { %v201_v5 = vmul.f32 %v200_v4, %v198_v3 }
  0xda   :  { %v202_v6 = vxor.u32 2147483648, %v201_v5 }
  0xdc   :  { %v203_v7 = vsel %vm82_vm12, %v202_v6, %v201_v5 }
  0xdd   :  { %v206_v9 = vsel %vm81_vm13, %v406_v22, %v203_v7 }
  0xde   :  { %v208_v10 = vmul.f32 %v206_v9, %v206_v9 }
  0xe0   :  { %v209_v11 = vmul.f32 -0.001358992, %v208_v10  ;;  %v216_v12 = vmul.f32 -0.00019511016, %v208_v10 }
  0xe2   :  { %v210_v14 = vadd.f32 0.041655596, %v209_v11  ;;  %v217_v15 = vadd.f32 0.008332121, %v216_v12 }
  0xe4   :  { %v211_v17 = vmul.f32 %v210_v14, %v208_v10  ;;  %v218_v18 = vmul.f32 %v217_v15, %v208_v10 }
  0xe6   :  { %v212_v19 = vadd.f32 -0.4999988, %v211_v17  ;;  %v219_v20 = vadd.f32 -0.16666654, %v218_v18 }
  0xe8   :  { %v213_v23 = vmul.f32 %v212_v19, %v208_v10  ;;  %v220_v24 = vmul.f32 %v219_v20, %v208_v10 }
  0xea   :  { %v214_v25 = vadd.f32 1.0, %v213_v23  ;;  %v221_v26 = vadd.f32 1.0, %v220_v24 }
  0xec   :  { %v222_v28 = vmul.f32 %v221_v26, %v206_v9  ;;  %v231_v29 = vxor.u32 2147483648, %v214_v25 }
  0xee   :  { %v228_v30 = vxor.u32 2147483648, %v222_v28  ;;  %v232_v35 = vsel %vm230_vm15, %v231_v29, %v222_v28 }
  0xf0   :  { %v229_v32 = vsel %vm227_vm14, %v214_v25, %v228_v30 }
  0xf1   :  { %v233_v36 = vsel %vm226_vm0, %v229_v32, %v232_v35 }
  0xf2   :  { %v234_v37 = vsel %vm223_vm1, nan, %v233_v36 }
  0xf3   :  { %235 = vst [vmem:[#allocation7] sm:$0xff] %v234_v37 }
  0xf4   :  { %239 = vsyncadd [#allocation4], 64  ;;  %s242_s25 = sshll.u32 %s475_s3, 4  ;;  %s372_s26 = smov [#allocation7]   ;;  %s243_s25 = int_to_ptr.hbm [resolvable:$true] %s242_s25 }
  0xf5   :  { %s240_s27 = sshll.u32 %s372_s26, 4  ;;  %s241_s27 = int_to_ptr.vmem [resolvable:$true] %s240_s27 }
  0xf6   :  { %248 = dma.vmem_to_hbm [thread:$0]  %s241_s27, 64, %s243_s25, [#allocation4], %s359_s20, %s359_s20, %s360_s21  }
  0xf7   :  { %356 = dma.done.wait [#allocation4], 128  }
  0xf8   :  { %357 = vsyncadd [#allocation4], 4294967168 }
  0xf9   :  { %253 = vsyncpa [#allocation3], 1 }
  0xfa   :  { %254 = vsyncpa [#allocation6], 1 }
  0xfb   :  { %255 = vsyncpa [#allocation4], 1 }

</bundles_post_ra>
